<compile_context>
chip_gen: v5e
topology: v5e:2x2
jax: 0.10.0
libtpu: 0.0.40
codegen_flags: <defaults>
</compile_context>

<pallas_src>
import functools

import jax
import jax.numpy as jnp
from jax import lax
from jax.experimental import pallas as pl
from jax.experimental.pallas import tpu as pltpu

_LANES = 128
_SUBLANES = 8


def _round_up(x, m):
    return ((x + m - 1) // m) * m


def _cdiv(a, b):
    return (a + b - 1) // b


def _log_softmax_rows(x):
    # Numerically stable log-softmax over the class (lane) axis, f32 in/out.
    m = jnp.max(x, axis=-1, keepdims=True)
    shifted = x - m
    lse = jnp.log(jnp.sum(jnp.exp(shifted), axis=-1, keepdims=True))
    return shifted - lse


def _write_partial(o_ref, partial):
    # Lane-dense (8, 128) output slab: partial at [0, 0], zeros elsewhere, so
    # the wrapper finishes with a single jnp.sum (full unmasked vector store).
    ri = lax.broadcasted_iota(jnp.int32, o_ref.shape, 0)
    ci = lax.broadcasted_iota(jnp.int32, o_ref.shape, 1)
    o_ref[...] = jnp.where((ri == 0) & (ci == 0), partial, 0.0)


def _ce_ls_dense_kernel(x_ref, t_ref, o_ref, *, epsilon, num_classes, batch,
                        tile_n):
    """Dense-target path: targets is a (N, C) distribution (e.g. one-hot)."""
    i = pl.program_id(0)

    x = x_ref[...].astype(jnp.float32)          # (tn, C)
    t = t_ref[...].astype(jnp.float32)          # (tn, C)

    # Row-validity mask for the (possibly partial) tail block. (tn, 1) iota
    # only; broadcasts over the class axis inside jnp.where.
    row = lax.broadcasted_iota(jnp.int32, (x.shape[0], 1), 0) + i * tile_n
    valid = row < batch                         # (tn, 1) bool

    lp = _log_softmax_rows(x)                   # (tn, C)

    # Fused label smoothing: single weighted reduction, no extra sum(lp) pass.
    w = (1.0 - epsilon) * t + (epsilon / num_classes)
    contrib = jnp.where(valid, w * lp, 0.0)     # kills garbage/NaN tail rows
    _write_partial(o_ref, -jnp.sum(contrib))


def _ce_ls_label_kernel(x_ref, lbl_ref, o_ref, *, epsilon, num_classes, batch,
                        tile_n):
    """Integer-label path: only a (tn, 1) int32 label column is streamed."""
    i = pl.program_id(0)

    x = x_ref[...].astype(jnp.float32)          # (tn, C)
    lbl = lbl_ref[...]                          # (tn, 1) int32

    row = lax.broadcasted_iota(jnp.int32, (x.shape[0], 1), 0) + i * tile_n
    valid = row < batch                         # (tn, 1) bool

    lp = jnp.where(valid, _log_softmax_rows(x), 0.0)   # invalid rows -> 0

    # Folded smoothing: sum_c(-t_smooth * lp) =
    #   -(1-eps)*lp[label] - (eps/C)*sum_c(lp)
    col = lax.broadcasted_iota(jnp.int32, x.shape, 1)
    term_t = jnp.sum(jnp.where(col == lbl, lp, 0.0))
    term_u = jnp.sum(lp)
    partial = -(1.0 - epsilon) * term_t - (epsilon / num_classes) * term_u
    _write_partial(o_ref, partial)


def cross_entropy_label_smooth(inputs, targets, num_classes=300, epsilon=0.1,
                               tile_n=2048):
    """Pallas implementation of CrossEntropyLabelSmooth.forward.

    inputs:  (N, C) logits (f32 or bf16)
    targets: (N, C) target distribution (module's interface), or
             (N,)   integer class labels (fast path, halves HBM read traffic)
    returns: scalar f32 loss = sum_c(mean_n(-t_smooth * log_softmax(inputs)))
    """
    n, c = inputs.shape
    # Smoothing denominator must match the tensor width (correctness concern).
    assert c == num_classes, (c, num_classes)

    use_labels = targets.ndim == 1
    if use_labels:
        assert targets.shape == (n,)
        tgt = targets.astype(jnp.int32).reshape(n, 1)
        tgt_itemsize = 4
    else:
        assert targets.shape == (n, c)
        tgt = targets
        tgt_itemsize = jnp.dtype(tgt.dtype).itemsize

    # Row-tile sublane multiple: 8 for 32-bit streams, 16 for bf16, etc.
    sub = _SUBLANES
    for itemsize in (jnp.dtype(inputs.dtype).itemsize, tgt_itemsize):
        sub = max(sub, _SUBLANES * max(1, 4 // int(itemsize)))

    # Row tile: no batch padding (tail masked in-kernel). Prefer >= 2 grid
    # blocks so both v7x TensorCores get work; shrink the tile for small N.
    tn = max(sub, min(int(tile_n), _round_up(n, sub)))
    tn = _round_up(tn, sub)
    if _cdiv(n, tn) < 2 and n > sub:
        tn = _round_up(_cdiv(n, 2), sub)
    num_blocks = _cdiv(n, tn)

    common = dict(epsilon=float(epsilon), num_classes=int(num_classes),
                  batch=int(n), tile_n=int(tn))
    if use_labels:
        kernel = functools.partial(_ce_ls_label_kernel, **common)
        tgt_spec = pl.BlockSpec((tn, 1), lambda i: (i, 0))
    else:
        kernel = functools.partial(_ce_ls_dense_kernel, **common)
        tgt_spec = pl.BlockSpec((tn, c), lambda i: (i, 0))

    bytes_accessed = (inputs.size * jnp.dtype(inputs.dtype).itemsize
                      + tgt.size * tgt_itemsize
                      + num_blocks * _SUBLANES * _LANES * 4)
    cost = pl.CostEstimate(
        flops=int(6 * n * c),
        transcendentals=int(n * c + n),
        bytes_accessed=int(bytes_accessed),
    )

    partials = pl.pallas_call(
        kernel,
        out_shape=jax.ShapeDtypeStruct((num_blocks * _SUBLANES, _LANES),
                                       jnp.float32),
        grid=(num_blocks,),
        in_specs=[
            # Full-extent class block (== array dim C): no lane padding.
            pl.BlockSpec((tn, c), lambda i: (i, 0)),
            tgt_spec,
        ],
        out_specs=pl.BlockSpec((_SUBLANES, _LANES), lambda i: (i, 0)),
        compiler_params=pltpu.CompilerParams(
            # Independent per-block partial sums -> parallel (megacore on v7x).
            dimension_semantics=("parallel",),
            vmem_limit_bytes=32 * 1024 * 1024,
        ),
        cost_estimate=cost,
    )(inputs, tgt)

    return jnp.sum(partials) / n


def _reference(inputs, targets, num_classes=300, epsilon=0.1):
    log_probs = jax.nn.log_softmax(inputs.astype(jnp.float32), axis=1)
    t = (1.0 - epsilon) * targets.astype(jnp.float32) + epsilon / num_classes
    return jnp.sum(jnp.mean(-t * log_probs, axis=0))


if __name__ == "__main__":
    num_classes = 300
    epsilon = 0.1

    key = jax.random.PRNGKey(0)
    k_logits, k_labels, k_logits2, k_labels2 = jax.random.split(key, 4)

    # Case 1: module interface — dense one-hot targets, batch=8.
    batch = 8
    logits = jax.random.normal(k_logits, (batch, num_classes), dtype=jnp.float32)
    labels = jax.random.randint(k_labels, (batch,), 0, num_classes)
    targets = jax.nn.one_hot(labels, num_classes, dtype=jnp.float32)

    loss = jax.block_until_ready(
        cross_entropy_label_smooth(logits, targets, num_classes, epsilon))
    ref = _reference(logits, targets, num_classes, epsilon)
    assert jnp.allclose(loss, ref, rtol=1e-5, atol=1e-5), (loss, ref)

    # Case 2: integer-label fast path (no dense one-hot streamed from HBM).
    loss_lbl = jax.block_until_ready(
        cross_entropy_label_smooth(logits, labels, num_classes, epsilon))
    assert jnp.allclose(loss_lbl, ref, rtol=1e-5, atol=1e-5), (loss_lbl, ref)

    # Case 3: batch not a multiple of the row tile -> 2-block grid with a
    # partial tail block (exercises in-kernel masking instead of jnp.pad).
    batch2 = 11
    logits2 = jax.random.normal(k_logits2, (batch2, num_classes),
                                dtype=jnp.float32)
    labels2 = jax.random.randint(k_labels2, (batch2,), 0, num_classes)
    targets2 = jax.nn.one_hot(labels2, num_classes, dtype=jnp.float32)

    loss2 = jax.block_until_ready(
        cross_entropy_label_smooth(logits2, targets2, num_classes, epsilon))
    ref2 = _reference(logits2, targets2, num_classes, epsilon)
    assert jnp.allclose(loss2, ref2, rtol=1e-5, atol=1e-5), (loss2, ref2)

    print("KERNEL_OK")
</pallas_src>

<mosaic_0001>
module attributes {stable_mosaic.version = 11 : i64} {
  func.func @_ce_ls_dense_kernel(%arg0: i32, %arg1: memref<8x300xf32, #tpu.memory_space<vmem>>, %arg2: memref<8x300xf32, #tpu.memory_space<vmem>>, %arg3: memref<8x128xf32, #tpu.memory_space<vmem>>) attributes {dimension_semantics = [#tpu.dimension_semantics<parallel>], iteration_bounds = array<i64: 1>, scalar_prefetch = 0 : i64, scratch_operands = 0 : i64, tpu.core_type = #tpu.core_type<tc>, window_params = [{transform_indices = @transform_0, window_bounds = array<i64: 8, 300>}, {transform_indices = @transform_1, window_bounds = array<i64: 8, 300>}, {transform_indices = @transform_2, window_bounds = array<i64: 8, 128>}]} {
    %c0 = arith.constant 0 : index
    %c0_0 = arith.constant 0 : index
    %0 = vector.load %arg1[%c0, %c0_0] : memref<8x300xf32, #tpu.memory_space<vmem>>, vector<8x300xf32>
    %c0_1 = arith.constant 0 : index
    %c0_2 = arith.constant 0 : index
    %1 = vector.load %arg2[%c0_1, %c0_2] : memref<8x300xf32, #tpu.memory_space<vmem>>, vector<8x300xf32>
    %2 = tpu.iota {dimensions = array<i32: 0>} : vector<8x1xi32>
    %c8_i32 = arith.constant 8 : i32
    %3 = arith.muli %arg0, %c8_i32 : i32
    %4 = vector.broadcast %3 : i32 to vector<8x1xi32>
    %5 = arith.addi %2, %4 : vector<8x1xi32>
    %c8_i32_3 = arith.constant 8 : i32
    %6 = vector.broadcast %c8_i32_3 : i32 to vector<8x1xi32>
    %7 = arith.cmpi slt, %5, %6 : vector<8x1xi32>
    %cst = arith.constant dense<0xFF800000> : vector<8xf32>
    %8 = vector.multi_reduction <maximumf>, %0, %cst [1] : vector<8x300xf32> to vector<8xf32>
    %9 = vector.shape_cast %8 : vector<8xf32> to vector<8x1xf32>
    %10 = vector.broadcast %9 : vector<8x1xf32> to vector<8x300xf32>
    %11 = arith.subf %0, %10 : vector<8x300xf32>
    %12 = math.exp %11 : vector<8x300xf32>
    %cst_4 = arith.constant dense<0.000000e+00> : vector<8xf32>
    %13 = vector.multi_reduction <add>, %12, %cst_4 [1] : vector<8x300xf32> to vector<8xf32>
    %14 = vector.shape_cast %13 : vector<8xf32> to vector<8x1xf32>
    %15 = math.log %14 : vector<8x1xf32>
    %16 = vector.broadcast %15 : vector<8x1xf32> to vector<8x300xf32>
    %17 = arith.subf %11, %16 : vector<8x300xf32>
    %cst_5 = arith.constant 0.899999976 : f32
    %18 = vector.broadcast %cst_5 : f32 to vector<8x300xf32>
    %19 = arith.mulf %18, %1 : vector<8x300xf32>
    %cst_6 = arith.constant 3.3333333E-4 : f32
    %20 = vector.broadcast %cst_6 : f32 to vector<8x300xf32>
    %21 = arith.addf %19, %20 : vector<8x300xf32>
    %22 = arith.mulf %21, %17 : vector<8x300xf32>
    %cst_7 = arith.constant 0.000000e+00 : f32
    %23 = vector.shape_cast %7 : vector<8x1xi1> to vector<8x1xi1>
    %24 = vector.broadcast %23 : vector<8x1xi1> to vector<8x300xi1>
    %25 = vector.broadcast %cst_7 : f32 to vector<8x300xf32>
    %26 = arith.select %24, %22, %25 : vector<8x300xi1>, vector<8x300xf32>
    %27 = vector.shape_cast %26 : vector<8x300xf32> to vector<1x8x300xf32>
    %cst_8 = arith.constant dense<0.000000e+00> : vector<1xf32>
    %28 = vector.multi_reduction <add>, %27, %cst_8 [1, 2] : vector<1x8x300xf32> to vector<1xf32>
    %29 = vector.shape_cast %28 : vector<1xf32> to vector<1x1x1xf32>
    %30 = vector.extract %29[0, 0, 0] : f32 from vector<1x1x1xf32>
    %cst_9 = arith.constant 0.000000e+00 : f32
    %31 = arith.subf %cst_9, %30 : f32
    %32 = tpu.iota {dimensions = array<i32: 0>} : vector<8x128xi32>
    %33 = tpu.iota {dimensions = array<i32: 1>} : vector<8x128xi32>
    %c0_i32 = arith.constant 0 : i32
    %34 = vector.broadcast %c0_i32 : i32 to vector<8x128xi32>
    %35 = arith.cmpi eq, %32, %34 : vector<8x128xi32>
    %c0_i32_10 = arith.constant 0 : i32
    %36 = vector.broadcast %c0_i32_10 : i32 to vector<8x128xi32>
    %37 = arith.cmpi eq, %33, %36 : vector<8x128xi32>
    %38 = arith.andi %35, %37 : vector<8x128xi1>
    %cst_11 = arith.constant 0.000000e+00 : f32
    %39 = vector.broadcast %31 : f32 to vector<8x128xf32>
    %40 = vector.broadcast %cst_11 : f32 to vector<8x128xf32>
    %41 = arith.select %38, %39, %40 : vector<8x128xi1>, vector<8x128xf32>
    %c0_12 = arith.constant 0 : index
    %c0_13 = arith.constant 0 : index
    %42 = vector.load %arg3[%c0_12, %c0_13] : memref<8x128xf32, #tpu.memory_space<vmem>>, vector<8x128xf32>
    tpu.vector_store %arg3[%c0_12, %c0_13], %41 {strides = array<i32>} : memref<8x128xf32, #tpu.memory_space<vmem>>, vector<8x128xf32>,
    return
  }
  func.func @transform_0(%arg0: i32) -> (i32, i32) {
    %c0_i32 = arith.constant 0 : i32
    %c0_i32_0 = arith.constant 0 : i32
    return %arg0, %c0_i32 : i32, i32
  }
  func.func @transform_1(%arg0: i32) -> (i32, i32) {
    %c0_i32 = arith.constant 0 : i32
    %c0_i32_0 = arith.constant 0 : i32
    return %arg0, %c0_i32 : i32, i32
  }
  func.func @transform_2(%arg0: i32) -> (i32, i32) {
    %c0_i32 = arith.constant 0 : i32
    %c0_i32_0 = arith.constant 0 : i32
    return %arg0, %c0_i32 : i32, i32
  }
}

</mosaic_0001>

<bundles_post_ra>
// kernel: tpu_custom_call.1
= control target key start
LH: loop header
LB: loop body
LE: loop exit
PB: predicated region body
PF: predicated region fallthrough
CT: control target
= control target key end

     0   :  { %7 = vsyncpa [#allocation3], 0  ;;  %s251_s0 = inlined_call_operand.hbm [shape: f32[8,300], index: 0, kind: input, shape index: {}]   ;;  %s252_s1 = inlined_call_operand.hbm [shape: f32[8,300], index: 1, kind: input, shape index: {}]   ;;  %s253_s2 = inlined_call_operand.hbm [shape: f32[8,128], index: 2, kind: output, shape index: {}]  }
   0x1   :  { %8 = vsyncpa [#allocation6], 0 }
   0x2   :  { %9 = vsyncpa [#allocation4], 0  ;;  %s15_s11 = sshll.u32 %s251_s0, 4  ;;  %s221_s12 = smov [#allocation2]   ;;  %s16_s11 = int_to_ptr.hbm [resolvable:$true] %s15_s11 }
   0x3   :  { %s17_s13 = sshll.u32 %s221_s12, 4  ;;  %s26_s16 = sshll.u32 %s252_s1, 4  ;;  %s18_s13 = int_to_ptr.vmem [resolvable:$true] %s17_s13  ;;  %s27_s16 = int_to_ptr.hbm [resolvable:$true] %s26_s16 }
   0x4   :  { %20 = dma.hbm_to_vmem [thread:$0]  %s16_s11, 384, %s18_s13, [#allocation3]  }
   0x5   :  { %s222_s17 = smov [#allocation5]  }
   0x6   :  { %s28_s18 = sshll.u32 %s222_s17, 4  ;;  %s29_s18 = int_to_ptr.vmem [resolvable:$true] %s28_s18 }
   0x7   :  { %31 = dma.hbm_to_vmem [thread:$0]  %s27_s16, 384, %s29_s18, [#allocation6]  }
   0x8   :  { %215 = dma.done.wait [#allocation3], 384  }
   0x9   :  { %216 = vsyncadd [#allocation3], 4294966912 }
   0xa   :  { %217 = dma.done.wait [#allocation6], 384  }
   0xb   :  { %218 = vsyncadd [#allocation6], 4294966912  ;;  %vm52_vm0 = vcmask 359424   ;;  %v40_v0 = vld [vmem:[#allocation2] sm:$0xff]  ;;  %v41_v1 = vld [vmem:[#allocation2 + $0x8] sm:$0xff]  ;;  %v46_v47 = vlaneseq  ;;  %s223_s0 = smov [#allocation7]  }
   0xc   :  { %v42_v2 = vld [vmem:[#allocation2 + $0x10] sm:$0xff]  ;;  %v54_v4 = vmax.f32 %v40_v0, %v41_v1  ;;  %v43_v20 = vld [vmem:[#allocation5] sm:$0xff]  ;;  %v44_v21 = vld [vmem:[#allocation5 + $0x8] sm:$0xff]  ;;  %s117_s1 = sshll.u32 %s223_s0, 4  ;;  %s119_s22 = sshll.u32 %s253_s2, 4  ;;  %s118_s1 = int_to_ptr.vmem [resolvable:$true] %s117_s1  ;;  %s120_s22 = int_to_ptr.hbm [resolvable:$true] %s119_s22 }
   0xd   :  { %v53_v3 = vsel %vm52_vm0, %v42_v2, -inf  ;;  %v45_v22 = vld [vmem:[#allocation5 + $0x10] sm:$0xff]  ;;  %v77_v23 = vmul.f32 0.9, %v43_v20  ;;  %v78_v24 = vmul.f32 0.9, %v44_v21 }
   0xe   :  { %v55_v5 = vmax.f32 %v54_v4, %v53_v3  ;;  %v79_v25 = vmul.f32 0.9, %v45_v22  ;;  %v47_v48 = vshrl.u32 %v46_v47, 7  ;;  %v105_v49 = vand.u32 127, %v46_v47 }
   0xf   :  { %v80_v27 = vadd.f32 0.00033333333, %v77_v23  ;;  %v81_v29 = vadd.f32 0.00033333333, %v78_v24 }
  0x10   :  { %56 = vmax.xlane.f32.xlu0 %v55_v5  ;;  %v82_v30 = vadd.f32 0.00033333333, %v79_v25  ;;  %vm106_vm1 = vcmp.eq.s32.totalorder %v47_v48, 0  ;;  %vm107_vm2 = vcmp.eq.s32.totalorder %v105_v49, 0 }
  0x11   :  { %vm108_vm3 = vmand %vm106_vm1, %vm107_vm2 }
  0x83   :  { %v57_v6 = vpop.xlane.xlu0 %56 }
  0x84   :  { %v58_v7 = vsub.f32 %v40_v0, %v57_v6  ;;  %v59_v8 = vsub.f32 %v41_v1, %v57_v6  ;;  %v60_v9 = vsub.f32 %v42_v2, %v57_v6 }
  0x86   :  { %v61_v10 = vmul.f32 1.442695, %v58_v7  ;;  %v63_v11 = vmul.f32 1.442695, %v59_v8  ;;  %v65_v12 = vmul.f32 1.442695, %v60_v9 }
  0x88   :  { %135 = vpow2.f32 %v61_v10 }
  0x89   :  { %137 = vpow2.f32 %v63_v11 }
  0x8a   :  { %139 = vpow2.f32 %v65_v12 }
  0x8e   :  { %v136_v13 = vpop.eup %135 }
  0x8f   :  { %v138_v14 = vpop.eup %137 }
  0x90   :  { %v140_v15 = vpop.eup %139  ;;  %v67_v16 = vadd.f32 %v138_v14, %v136_v13 }
  0x91   :  { %v68_v17 = vsel %vm52_vm0, %v140_v15, 0.0 }
  0x92   :  { %v69_v18 = vadd.f32 %v68_v17, %v67_v16 }
  0x94   :  { %70 = vadd.xlane.f32.xlu0 %v69_v18 }
 0x107   :  { %v71_v19 = vpop.xlane.xlu0 %70 }
 0x108   :  { %141 = vlog2.f32 %v71_v19 }
 0x10e   :  { %v142_v26 = vpop.eup %141 }
 0x10f   :  { %v73_v28 = vmul.f32 0.6931472, %v142_v26 }
 0x111   :  { %v74_v31 = vsub.f32 %v58_v7, %v73_v28  ;;  %v75_v32 = vsub.f32 %v59_v8, %v73_v28  ;;  %v76_v33 = vsub.f32 %v60_v9, %v73_v28 }
 0x113   :  { %v83_v34 = vmul.f32 %v80_v27, %v74_v31  ;;  %v84_v35 = vmul.f32 %v81_v29, %v75_v32  ;;  %v85_v36 = vmul.f32 %v82_v30, %v76_v33 }
 0x115   :  { %v91_v37 = vadd.f32 %v84_v35, %v83_v34  ;;  %v92_v38 = vsel %vm52_vm0, %v85_v36, 0.0 }
 0x117   :  { %v93_v39 = vadd.f32 %v92_v38, %v91_v37 }
 0x119   :  { %94 = vadd.xlane.f32.xlu1 %v93_v39 }
 0x18c   :  { %v95_v40 = vpop.xlane.xlu1 %94 }
 0x18d   :  { %v96_v41 = vrot.slane %v95_v40, 4 }
 0x18f   :  { %v97_v42 = vadd.f32 %v96_v41, %v95_v40 }
 0x191   :  { %v98_v43 = vrot.slane %v97_v42, 2 }
 0x193   :  { %v99_v44 = vadd.f32 %v98_v43, %v97_v42 }
 0x195   :  { %v100_v45 = vrot.slane %v99_v44, 1 }
 0x197   :  { %v101_v46 = vadd.f32 %v100_v45, %v99_v44 }
 0x199   :  { %130 = vpush %v101_v46 }
 0x1ca   :  { %s131_s19 = spop %130 }
 0x1cb   :  { %s103_s23 = ssub.f32 0.0, %s131_s19 }
 0x1cd   :  { %v109_v50 = vstv %s103_s23 }
 0x1ce   :  { %v110_v51 = vsel %vm108_vm3, %v109_v50, 0.0 }
 0x1cf   :  { %111 = vst [vmem:[#allocation7] sm:$0xff] %v110_v51 }
 0x1d0   :  { %122 = dma.vmem_to_hbm [thread:$0]  %s118_s1, 128, %s120_s22, [#allocation4]  }
 0x1d1   :  { %219 = dma.done.wait [#allocation4], 128  }
 0x1d2   :  { %220 = vsyncadd [#allocation4], 4294967168 }
 0x1d3   :  { %127 = vsyncpa [#allocation3], 1 }
 0x1d4   :  { %128 = vsyncpa [#allocation6], 1 }
 0x1d5   :  { %129 = vsyncpa [#allocation4], 1 }

</bundles_post_ra>
